<compile_context>
chip_gen: v7x
topology: tpu7x:2x2x1
jax: 0.10.0
libtpu: 0.0.40
codegen_flags: <defaults>
</compile_context>

<pallas_src>
import numpy as np
import jax
import jax.numpy as jnp
from jax.experimental import pallas as pl
from jax.experimental.pallas import tpu as pltpu


def actor_kernel(x_ref, w1_ref, b1_ref, w2_ref, b2_ref, out_ref):
    """out = tanh(relu(x @ w1 + b1) @ w2 + b2); bf16 MXU inputs, f32 epilogue."""
    x = x_ref[...].astype(jnp.bfloat16)                    # (TB, S) f32 -> bf16 in-kernel
    h = jnp.dot(x, w1_ref[...], preferred_element_type=jnp.float32)
    h = jnp.maximum(h + b1_ref[...], 0.0)                  # f32 bias add + ReLU
    h = h.astype(jnp.bfloat16)                             # bf16 for second MXU pass
    y = jnp.dot(h, w2_ref[...], preferred_element_type=jnp.float32)
    y = y + b2_ref[...]
    # Narrow (TB, A) store: A is the full last dim so the HBM write is a
    # contiguous block -- 32x fewer bytes than a 128-padded f32 slab.
    out_ref[...] = jnp.tanh(y).astype(out_ref.dtype)


def _round_up(x, m):
    return ((x + m - 1) // m) * m


def prep_actor_params(w1, b1, w2, b2):
    """One-time parameter prep (hoisted out of the per-call forward path)."""
    F1 = w1.shape[1]
    A = w2.shape[1]
    return (
        w1.astype(jnp.bfloat16),                 # (S, F1)  bf16 MXU weight
        b1.reshape(1, F1).astype(jnp.float32),   # (1, F1)  f32 bias
        w2.astype(jnp.bfloat16),                 # (F1, A)  bf16 MXU weight
        b2.reshape(1, A).astype(jnp.float32),    # (1, A)   f32 bias
    )


_MAX_TB = 4096    # batch-tile cap: (4096,16) f32 x-tile ~256 KiB double-buffered
_SMALL_B = 512    # below this: single grid step (launch-overhead bound regardless)


def actor_forward(state, prepped):
    """Mirrors Actor.forward. state: (B, S) or (S,) float32 -> (B, A) float32."""
    w1, b1_2d, w2, b2_2d = prepped
    if state.ndim == 1:
        state = state[None, :]                   # matches state.unsqueeze(0)
    B, S = state.shape
    A = w2.shape[1]

    # Pad the batch only to a multiple of 16 (bf16 sublane pack), never to TB.
    B16 = _round_up(max(B, 16), 16)
    if B16 <= _SMALL_B:
        TB = B16
    else:
        # >= 2 balanced steps so "parallel" grid sharding feeds both TCs on v7x.
        n_steps = max(2, pl.cdiv(B16, _MAX_TB))
        TB = _round_up(pl.cdiv(B16, n_steps), 16)
    n_blocks = pl.cdiv(B16, TB)
    B_pad = n_blocks * TB
    if B_pad != B:
        state = jnp.pad(state, ((0, B_pad - B), (0, 0)))

    out = pl.pallas_call(
        actor_kernel,
        out_shape=jax.ShapeDtypeStruct((B_pad, A), jnp.float32),
        grid=(n_blocks,),
        in_specs=[
            pl.BlockSpec((TB, S), lambda i: (i, 0)),         # activations: batch-tiled
            pl.BlockSpec(w1.shape, lambda i: (0, 0)),        # weights stay VMEM-resident
            pl.BlockSpec(b1_2d.shape, lambda i: (0, 0)),
            pl.BlockSpec(w2.shape, lambda i: (0, 0)),
            pl.BlockSpec(b2_2d.shape, lambda i: (0, 0)),
        ],
        out_specs=pl.BlockSpec((TB, A), lambda i: (i, 0)),   # narrow contiguous writeback
        compiler_params=pltpu.CompilerParams(
            dimension_semantics=("parallel",),               # shard batch across TCs (v7x)
        ),
    )(state, w1, b1_2d, w2, b2_2d)

    return out[:B]


def init_actor_params(key, state_size, fc1_units, action_size, weight_init_lim=3e-3):
    """Deterministic init mimicking Actor.reset_parameters + default bias init."""
    k1, k2, k3, k4 = jax.random.split(key, 4)
    # hidden_init uses weight.size()[0] == out_features (fc1_units) as "fan_in"
    # (quirk preserved from the PyTorch reference).
    lim1 = 1.0 / np.sqrt(fc1_units)
    w1 = jax.random.uniform(k1, (state_size, fc1_units), jnp.float32,
                            minval=-lim1, maxval=lim1)
    blim1 = 1.0 / np.sqrt(state_size)      # PyTorch default Linear bias init
    b1 = jax.random.uniform(k2, (fc1_units,), jnp.float32,
                            minval=-blim1, maxval=blim1)
    w2 = jax.random.uniform(k3, (fc1_units, action_size), jnp.float32,
                            minval=-weight_init_lim, maxval=weight_init_lim)
    blim2 = 1.0 / np.sqrt(fc1_units)
    b2 = jax.random.uniform(k4, (action_size,), jnp.float32,
                            minval=-blim2, maxval=blim2)
    return w1, b1, w2, b2


def _ref_forward(state, w1, b1, w2, b2):
    if state.ndim == 1:
        state = state[None, :]
    return jnp.tanh(jnp.maximum(state @ w1 + b1, 0.0) @ w2 + b2)


if __name__ == "__main__":
    # Small shapes consistent with the module's forward.
    batch = 8
    state_size = 16
    fc1_units = 32          # cfg['Model']['fc1_size_actor']
    action_size = 4
    weight_init_lim = 3e-3  # cfg['Model']['weight_init_lim']

    key = jax.random.PRNGKey(0)
    kx, kp, kx2 = jax.random.split(key, 3)
    state = jax.random.normal(kx, (batch, state_size), jnp.float32)
    w1, b1, w2, b2 = init_actor_params(kp, state_size, fc1_units,
                                       action_size, weight_init_lim)
    prepped = prep_actor_params(w1, b1, w2, b2)

    # 1) Small-batch path (single grid step).
    actions = actor_forward(state, prepped)
    jax.block_until_ready(actions)
    assert actions.shape == (batch, action_size)
    ref = _ref_forward(state, w1, b1, w2, b2)
    # bf16 MXU inputs -> loosened tolerance vs the f32 reference.
    np.testing.assert_allclose(np.asarray(actions), np.asarray(ref),
                               rtol=2e-2, atol=2e-2)

    # 2) 1-D state path (exercises the unsqueeze branch).
    a1 = actor_forward(state[0], prepped)
    jax.block_until_ready(a1)
    assert a1.shape == (1, action_size)
    np.testing.assert_allclose(np.asarray(a1), np.asarray(ref[:1]),
                               rtol=2e-2, atol=2e-2)

    # 3) Non-aligned batch (pads only to a multiple of 16, not to TB).
    big = jax.random.normal(kx2, (300, state_size), jnp.float32)
    a_big = actor_forward(big, prepped)
    jax.block_until_ready(a_big)
    assert a_big.shape == (300, action_size)
    ref_big = _ref_forward(big, w1, b1, w2, b2)
    np.testing.assert_allclose(np.asarray(a_big), np.asarray(ref_big),
                               rtol=2e-2, atol=2e-2)

    # 4) Larger batch exercising the multi-step balanced grid (2 tiles).
    big2 = jax.random.normal(kx2, (1000, state_size), jnp.float32)
    a_big2 = actor_forward(big2, prepped)
    jax.block_until_ready(a_big2)
    assert a_big2.shape == (1000, action_size)
    ref_big2 = _ref_forward(big2, w1, b1, w2, b2)
    np.testing.assert_allclose(np.asarray(a_big2), np.asarray(ref_big2),
                               rtol=2e-2, atol=2e-2)

    print("KERNEL_OK")
</pallas_src>

<mosaic_0001>
module attributes {stable_mosaic.version = 11 : i64} {
  func.func @actor_kernel(%arg0: i32, %arg1: memref<16x16xf32, #tpu.memory_space<vmem>>, %arg2: memref<16x32xbf16, #tpu.memory_space<vmem>>, %arg3: memref<1x32xf32, #tpu.memory_space<vmem>>, %arg4: memref<32x4xbf16, #tpu.memory_space<vmem>>, %arg5: memref<1x4xf32, #tpu.memory_space<vmem>>, %arg6: memref<16x4xf32, #tpu.memory_space<vmem>>) attributes {dimension_semantics = [#tpu.dimension_semantics<parallel>], iteration_bounds = array<i64: 1>, scalar_prefetch = 0 : i64, scratch_operands = 0 : i64, tpu.core_type = #tpu.core_type<tc>, window_params = [{transform_indices = @transform_0, window_bounds = array<i64: 16, 16>}, {pipeline_mode = #tpu.pipeline_mode<synchronous>, transform_indices = @transform_1, window_bounds = array<i64: 16, 32>}, {pipeline_mode = #tpu.pipeline_mode<synchronous>, transform_indices = @transform_2, window_bounds = array<i64: 1, 32>}, {pipeline_mode = #tpu.pipeline_mode<synchronous>, transform_indices = @transform_3, window_bounds = array<i64: 32, 4>}, {pipeline_mode = #tpu.pipeline_mode<synchronous>, transform_indices = @transform_4, window_bounds = array<i64: 1, 4>}, {transform_indices = @transform_5, window_bounds = array<i64: 16, 4>}]} {
    %c0 = arith.constant 0 : index
    %c0_0 = arith.constant 0 : index
    %0 = vector.load %arg1[%c0, %c0_0] : memref<16x16xf32, #tpu.memory_space<vmem>>, vector<16x16xf32>
    %1 = arith.truncf %0 : vector<16x16xf32> to vector<16x16xbf16>
    %c0_1 = arith.constant 0 : index
    %c0_2 = arith.constant 0 : index
    %2 = vector.load %arg2[%c0_1, %c0_2] : memref<16x32xbf16, #tpu.memory_space<vmem>>, vector<16x32xbf16>
    %cst = arith.constant dense<0.000000e+00> : vector<16x32xf32>
    %3 = tpu.matmul %1, %2, %cst {dimension_numbers = #tpu.dot_dimension_numbers<[1], [0], [0], [1], [0, 0, 1, 1], [], []>} : vector<16x16xbf16>, vector<16x32xbf16>, vector<16x32xf32> -> vector<16x32xf32>
    %c0_3 = arith.constant 0 : index
    %c0_4 = arith.constant 0 : index
    %4 = vector.load %arg3[%c0_3, %c0_4] : memref<1x32xf32, #tpu.memory_space<vmem>>, vector<1x32xf32>
    %5 = vector.broadcast %4 : vector<1x32xf32> to vector<16x32xf32>
    %6 = arith.addf %3, %5 : vector<16x32xf32>
    %cst_5 = arith.constant 0.000000e+00 : f32
    %7 = vector.broadcast %cst_5 : f32 to vector<16x32xf32>
    %8 = arith.maximumf %6, %7 : vector<16x32xf32>
    %9 = arith.truncf %8 : vector<16x32xf32> to vector<16x32xbf16>
    %c0_6 = arith.constant 0 : index
    %c0_7 = arith.constant 0 : index
    %10 = vector.load %arg4[%c0_6, %c0_7] : memref<32x4xbf16, #tpu.memory_space<vmem>>, vector<32x4xbf16>
    %cst_8 = arith.constant dense<0.000000e+00> : vector<16x4xf32>
    %11 = tpu.matmul %9, %10, %cst_8 {dimension_numbers = #tpu.dot_dimension_numbers<[1], [0], [0], [1], [0, 0, 1, 1], [], []>} : vector<16x32xbf16>, vector<32x4xbf16>, vector<16x4xf32> -> vector<16x4xf32>
    %c0_9 = arith.constant 0 : index
    %c0_10 = arith.constant 0 : index
    %12 = vector.load %arg5[%c0_9, %c0_10] : memref<1x4xf32, #tpu.memory_space<vmem>>, vector<1x4xf32>
    %13 = vector.broadcast %12 : vector<1x4xf32> to vector<16x4xf32>
    %14 = arith.addf %11, %13 : vector<16x4xf32>
    %15 = math.tanh %14 : vector<16x4xf32>
    %c0_11 = arith.constant 0 : index
    %c0_12 = arith.constant 0 : index
    %16 = vector.load %arg6[%c0_11, %c0_12] : memref<16x4xf32, #tpu.memory_space<vmem>>, vector<16x4xf32>
    tpu.vector_store %arg6[%c0_11, %c0_12], %15 {strides = array<i32>} : memref<16x4xf32, #tpu.memory_space<vmem>>, vector<16x4xf32>,
    return
  }
  func.func @transform_0(%arg0: i32) -> (i32, i32) {
    %c0_i32 = arith.constant 0 : i32
    %c0_i32_0 = arith.constant 0 : i32
    return %arg0, %c0_i32 : i32, i32
  }
  func.func @transform_1(%arg0: i32) -> (i32, i32) {
    %c0_i32 = arith.constant 0 : i32
    %c0_i32_0 = arith.constant 0 : i32
    %c0_i32_1 = arith.constant 0 : i32
    return %c0_i32, %c0_i32_0 : i32, i32
  }
  func.func @transform_2(%arg0: i32) -> (i32, i32) {
    %c0_i32 = arith.constant 0 : i32
    %c0_i32_0 = arith.constant 0 : i32
    %c0_i32_1 = arith.constant 0 : i32
    return %c0_i32, %c0_i32_0 : i32, i32
  }
  func.func @transform_3(%arg0: i32) -> (i32, i32) {
    %c0_i32 = arith.constant 0 : i32
    %c0_i32_0 = arith.constant 0 : i32
    %c0_i32_1 = arith.constant 0 : i32
    return %c0_i32, %c0_i32_0 : i32, i32
  }
  func.func @transform_4(%arg0: i32) -> (i32, i32) {
    %c0_i32 = arith.constant 0 : i32
    %c0_i32_0 = arith.constant 0 : i32
    %c0_i32_1 = arith.constant 0 : i32
    return %c0_i32, %c0_i32_0 : i32, i32
  }
  func.func @transform_5(%arg0: i32) -> (i32, i32) {
    %c0_i32 = arith.constant 0 : i32
    %c0_i32_0 = arith.constant 0 : i32
    return %arg0, %c0_i32 : i32, i32
  }
}

</mosaic_0001>

<bundles_post_ra>
// kernel: tpu_custom_call.1
= control target key start
LH: loop header
LB: loop body
LE: loop exit
PB: predicated region body
PF: predicated region fallthrough
CT: control target
= control target key end

     0   :  { %10 = vsyncpa [#allocation3], 0  ;;  %s241_s18 = smov [#allocation2]   ;;  %s312_s0 = inlined_call_operand.vmem [shape: f32[16,16], index: 0, kind: input, shape index: {}]   ;;  %s313_s1 = inlined_call_operand.hbm [shape: bf16[16,32], index: 1, kind: input, shape index: {}]   ;;  %s314_s2 = inlined_call_operand.vmem [shape: f32[1,32], index: 2, kind: input, shape index: {}]   ;;  %s315_s3 = inlined_call_operand.vmem [shape: bf16[32,4], index: 3, kind: input, shape index: {}]   ;;  %s316_s4 = inlined_call_operand.vmem [shape: f32[1,4], index: 4, kind: input, shape index: {}]   ;;  %s317_s5 = inlined_call_operand.vmem [shape: f32[16,4], index: 5, kind: output, shape index: {}]  }
   0x1   :  { %s18_s19 = sshll.u32 %s241_s18, 4  ;;  %s217_s22 = scalar_lea.hbm %s313_s1, 128  ;;  %s19_s19 = int_to_ptr.vmem [resolvable:$true] %s18_s19 }
   0x2   :  { %p218_p0 = scmp.ne.s32.totalorder %s313_s1, %s217_s22  ;;  %p221_p1 = scmp.lt.u32.totalorder %s217_s22, %s313_s1 }
   0x4   :  { %p223_p2 = pnand %p221_p1, %p218_p0 }
   0x6   :  { %226 = shalt.err (!%p223_p2)
}
   0x7   :  { %s227_s27 = scalar_lea.vmem %s19_s19, 128  ;;  %p232_p4 = scmp.lt.s32.totalorder %s19_s19, %s19_s19 }
   0x8   :  { %p228_p3 = scmp.ne.s32.totalorder %s19_s19, %s227_s27  ;;  %p233_p5 = scmp.lt.s32.totalorder %s227_s27, %s227_s27 }
   0xa   :  { %p234_p6 = por %p233_p5, %p232_p4 }
   0xc   :  { %p235_p7 = pnand %p234_p6, %p228_p3 }
   0xe   :  { %238 = shalt.err (!%p235_p7)
}
   0xf   :  { %s242_s28 = smov 64   ;;  %s243_s29 = smov 4  }
  0x10   :  { %24 = dma.hbm_to_vmem [thread:$0]  %s313_s1, 128, %s19_s19, [#allocation3], %s242_s28, %s242_s28, %s243_s29  }
  0x11   :  { %239 = dma.done.wait [#allocation3], 128  }
  0x12   :  { %240 = vsyncadd [#allocation3], 4294967168  ;;  %v244_v0 = vmov 0.0   ;;  %vm245_vm0 = vmmov 0   ;;  %v210_v1 = vld [vmem:[#allocation2] sm:$0xff]   ;;  %v36_v3 = vld [vmem:[%s312_s0 + $0x8] sm:$0xff] }
  0x13   :  { %191 = vmatprep.subr.bf16.mxu0 %v244_v0  ;;  %193 = vmatprep.mubr.msk.bf16.mxu0 %vm245_vm0, %v244_v0  ;;  %v35_v2 = vld [vmem:[%s312_s0] sm:$0xff]  ;;  %vm53_vm1 = vcmask 130048   ;;  %v212_v6 = vld [vmem:[%s315_s3 + $0x8] sm:$0xff]   ;;  %vm124_vm2 = vcmask 261120   ;;  %vm171_vm3 = vcmask 31744  }
  0x14   :  { %197 = vmatprep.subr.bf16.mxu1 %v244_v0  ;;  %201 = vmatprep.mubr.msk.bf16.mxu1 %vm245_vm0, %v244_v0  ;;  %v37_v4 = vpack.c.bf16 %v36_v3, %v35_v2  ;;  %v211_v5 = vld [vmem:[%s315_s3] sm:$0xff]  }
  0x15   :  { %192 = vmatpush3.bf16.msra.mxu0 %v210_v1  ;;  %198 = vmatpush3.bf16.msra.mxu1 %v211_v5  ;;  %v179_v7 = vld [vmem:[%s314_s2] ss:$0 sm:$0xff] }
  0x16   :  { %199 = vmatprep.subr.bf16.mxu1 %v244_v0  ;;  %v182_v17 = vld [vmem:[%s316_s4] ss:$0 sm:$0xff] }
  0x18   :  { %194 = vmatmul.mubr.msk.bf16.vlgmr.msra.gmra.mrb[0].mxu0 %vm53_vm1, %v37_v4 }
  0x19   :  { %200 = vmatpush3.bf16.msra.mxu1 %v212_v6 }
  0xeb   :  { %v91_v8 = vpop.f32.mrb[0].mxu0 }
  0xec   :  { %v92_v9 = vadd.f32 %v179_v7, %v91_v8  ;;  %v195_v10 = vpop.f32.mrb[1].mxu0 }
  0xed   :  { %v94_v11 = vpop.f32.mrb[2].mxu0 }
  0xee   :  { %v95_v12 = vadd.f32 %v179_v7, %v94_v11  ;;  %v196_v13 = vpop.f32.mrb[3].mxu0  ;;  %v98_v14 = vmax.f32 %v92_v9, 0.0 }
  0xf0   :  { %v99_v15 = vmax.f32 %v95_v12, 0.0 }
  0xf2   :  { %v100_v16 = vpack.c.bf16 %v99_v15, %v98_v14 }
  0xf4   :  { %202 = vmatmul.mubr.msk.bf16.vlgmr.msra.gmra.mrb[0].mxu1 %vm124_vm2, %v100_v16 }
 0x1c7   :  { %v162_v18 = vpop.f32.mrb[0].mxu1 }
 0x1c8   :  { %v163_v19 = vadd.f32 %v182_v17, %v162_v18  ;;  %v203_v20 = vpop.f32.mrb[1].mxu1 }
 0x1c9   :  { %v165_v21 = vpop.f32.mrb[2].mxu1 }
 0x1ca   :  { %213 = vtanh.f32 %v163_v19  ;;  %v166_v22 = vadd.f32 %v182_v17, %v165_v21  ;;  %v204_v23 = vpop.f32.mrb[3].mxu1 }
 0x1cc   :  { %215 = vtanh.f32 %v166_v22 }
 0x1d4   :  { %v214_v24 = vpop.eup %213 }
 0x1d5   :  { %172 = vst.msk [vmem:[%s317_s5] sm:$0xff] %vm171_vm3, %v214_v24 }
 0x1d6   :  { %v216_v25 = vpop.eup %215 }
 0x1d7   :  { %173 = vst.msk [vmem:[%s317_s5 + $0x8] sm:$0xff] %vm171_vm3, %v216_v25 }
 0x1d8   :  { %178 = vsyncpa [#allocation3], 1 }

</bundles_post_ra>
